<compile_context>
chip_gen: v7x
topology: tpu7x:2x2x1
jax: 0.10.0
libtpu: 0.0.40
codegen_flags: <defaults>
</compile_context>

<pallas_src>
import functools

import jax
import jax.numpy as jnp
from jax.experimental import pallas as pl
from jax.experimental.pallas import tpu as pltpu


def features_kernel(x_ref, wb1_ref, w2b_ref, o_ref):
    # x_ref:   (tm, 1)    f32   batch tile
    # wb1_ref: (2, L)     f32   row 0 = w1, row 1 = b1   (layer 1, VPU path)
    # w2b_ref: (L+1, O)   bf16  rows 0..L-1 = w2, row L = b2 (layer 2, MXU path)
    # o_ref:   (tm, O)    f32
    x = x_ref[...]                                    # (tm, 1)

    # Layer 1: Linear(1, L) is an outer product -> pure VPU broadcast mul/add.
    w1 = wb1_ref[0:1, :]                              # (1, L)
    b1 = wb1_ref[1:2, :]                              # (1, L)
    h = jnp.maximum(x * w1 + b1, 0.0)                 # (tm, L), ReLU
    # TODO(synk): dropout d1/d2 are identity in eval mode; training-mode
    # stochastic dropout would use pltpu.prng_seed / pltpu.prng_random_bits.

    # Layer 2: Linear(L, O) on the MXU, bf16 inputs with f32 accumulation.
    L = w2b_ref.shape[0] - 1
    w2 = w2b_ref[0:L, :]                              # (L, O) bf16
    b2 = w2b_ref[L:L + 1, :].astype(jnp.float32)      # (1, O)
    y = jnp.dot(h.astype(jnp.bfloat16), w2,
                preferred_element_type=jnp.float32)   # (tm, O) f32 acc
    o_ref[...] = (y + b2).astype(o_ref.dtype)


def make_features_forward(w1, b1, w2, b2, *, block_b=512):
    """Build a jitted forward fn with weights pre-packed/pre-cast (hoisted).

    w1: (1, L); b1: (L,); w2: (L, O); b2: (O,)  (stored as (in, out)).
    Returns forward(x) with x: (B, 1) -> (B, O).
    """
    L = w1.shape[1]
    O = w2.shape[1]
    assert block_b % 8 == 0, "batch tile must be a multiple of 8 sublanes"

    # One-time packing (NOT in the per-call path).
    wb1 = jnp.concatenate([w1.reshape(1, L), b1.reshape(1, L)], axis=0)
    wb1 = wb1.astype(jnp.float32)                               # (2, L)
    w2b = jnp.concatenate([w2.reshape(L, O), b2.reshape(1, O)], axis=0)
    w2b = w2b.astype(jnp.bfloat16)                              # (L+1, O)

    def forward(x):
        B = x.shape[0]
        tm = B if B <= block_b else block_b
        nb = pl.cdiv(B, tm)
        return pl.pallas_call(
            features_kernel,
            out_shape=jax.ShapeDtypeStruct((B, O), x.dtype),
            grid=(nb,),
            in_specs=[
                pl.BlockSpec((tm, 1), lambda i: (i, 0)),        # batch tile
                pl.BlockSpec((2, L), lambda i: (0, 0)),         # VMEM-resident
                pl.BlockSpec((L + 1, O), lambda i: (0, 0)),     # VMEM-resident
            ],
            out_specs=pl.BlockSpec((tm, O), lambda i: (i, 0)),
            compiler_params=pltpu.CompilerParams(
                dimension_semantics=("parallel",)),
        )(x, wb1, w2b)

    return jax.jit(forward)


def init_params(key, latent_dim, output_dim, dtype=jnp.float32):
    """Deterministic init mimicking nn.Linear default (uniform +-1/sqrt(fan_in))."""
    k1, k2, k3, k4 = jax.random.split(key, 4)
    bound1 = 1.0 / jnp.sqrt(1.0)          # fan_in = 1 for linear1
    bound2 = 1.0 / jnp.sqrt(latent_dim)   # fan_in = latent_dim for linear2
    # Stored transposed: (in_features, out_features)
    w1 = jax.random.uniform(k1, (1, latent_dim), dtype, -bound1, bound1)
    b1 = jax.random.uniform(k2, (latent_dim,), dtype, -bound1, bound1)
    w2 = jax.random.uniform(k3, (latent_dim, output_dim), dtype, -bound2, bound2)
    b2 = jax.random.uniform(k4, (output_dim,), dtype, -bound2, bound2)
    return w1, b1, w2, b2


def reference_forward(x, w1, b1, w2, b2):
    """Pure-f32 reference (original module semantics, eval mode)."""
    h = jnp.maximum(x @ w1 + b1, 0.0)
    return h @ w2 + b2


def reference_forward_bf16(x, w1, b1, w2, b2):
    """Reference with the same bf16 layer-2 quantization as the kernel."""
    h = jnp.maximum(x @ w1 + b1, 0.0).astype(jnp.bfloat16)
    y = jnp.dot(h, w2.astype(jnp.bfloat16), preferred_element_type=jnp.float32)
    return y + b2.astype(jnp.bfloat16).astype(jnp.float32)


if __name__ == "__main__":
    key = jax.random.PRNGKey(0)
    batch, latent_dim, output_dim = 8, 32, 8

    kx, kp = jax.random.split(key)
    x = jax.random.normal(kx, (batch, 1), jnp.float32)
    w1, b1, w2, b2 = init_params(kp, latent_dim, output_dim)

    forward = make_features_forward(w1, b1, w2, b2)

    # Small batch: single full-extent block (grid of 1).
    out = jax.block_until_ready(forward(x))
    assert out.shape == (batch, output_dim)
    assert jnp.allclose(out, reference_forward_bf16(x, w1, b1, w2, b2),
                        atol=1e-3, rtol=1e-3)
    # Loose check vs. the pure-f32 module (slack is only the bf16 weight cast).
    assert jnp.allclose(out, reference_forward(x, w1, b1, w2, b2),
                        atol=1e-1, rtol=1e-1)

    # Larger batch: exercises the tiled ("parallel") grid path.
    x_large = jax.random.normal(kx, (1024, 1), jnp.float32)
    out_large = jax.block_until_ready(forward(x_large))
    assert out_large.shape == (1024, output_dim)
    assert jnp.allclose(out_large, reference_forward_bf16(x_large, w1, b1, w2, b2),
                        atol=1e-3, rtol=1e-3)
    assert jnp.allclose(out_large, reference_forward(x_large, w1, b1, w2, b2),
                        atol=1e-1, rtol=1e-1)

    print("KERNEL_OK")
</pallas_src>

<mosaic_0001>
module attributes {stable_mosaic.version = 11 : i64} {
  func.func @features_kernel(%arg0: i32, %arg1: memref<8x1xf32, #tpu.memory_space<vmem>>, %arg2: memref<2x32xf32, #tpu.memory_space<vmem>>, %arg3: memref<33x8xbf16, #tpu.memory_space<vmem>>, %arg4: memref<8x8xf32, #tpu.memory_space<vmem>>) attributes {dimension_semantics = [#tpu.dimension_semantics<parallel>], iteration_bounds = array<i64: 1>, scalar_prefetch = 0 : i64, scratch_operands = 0 : i64, tpu.core_type = #tpu.core_type<tc>, window_params = [{transform_indices = @transform_0, window_bounds = array<i64: 8, 1>}, {pipeline_mode = #tpu.pipeline_mode<synchronous>, transform_indices = @transform_1, window_bounds = array<i64: 2, 32>}, {pipeline_mode = #tpu.pipeline_mode<synchronous>, transform_indices = @transform_2, window_bounds = array<i64: 33, 8>}, {transform_indices = @transform_3, window_bounds = array<i64: 8, 8>}]} {
    %c0 = arith.constant 0 : index
    %c0_0 = arith.constant 0 : index
    %0 = vector.load %arg1[%c0, %c0_0] : memref<8x1xf32, #tpu.memory_space<vmem>>, vector<8x1xf32>
    %c0_1 = arith.constant 0 : index
    %c0_2 = arith.constant 0 : index
    %1 = vector.load %arg2[%c0_1, %c0_2] : memref<2x32xf32, #tpu.memory_space<vmem>>, vector<1x32xf32>
    %c1 = arith.constant 1 : index
    %c0_3 = arith.constant 0 : index
    %2 = vector.load %arg2[%c1, %c0_3] : memref<2x32xf32, #tpu.memory_space<vmem>>, vector<1x32xf32>
    %3 = vector.broadcast %0 : vector<8x1xf32> to vector<8x32xf32>
    %4 = vector.broadcast %1 : vector<1x32xf32> to vector<8x32xf32>
    %5 = arith.mulf %3, %4 : vector<8x32xf32>
    %6 = vector.broadcast %2 : vector<1x32xf32> to vector<8x32xf32>
    %7 = arith.addf %5, %6 : vector<8x32xf32>
    %cst = arith.constant 0.000000e+00 : f32
    %8 = vector.broadcast %cst : f32 to vector<8x32xf32>
    %9 = arith.maximumf %7, %8 : vector<8x32xf32>
    %c0_4 = arith.constant 0 : index
    %c0_5 = arith.constant 0 : index
    %10 = vector.load %arg3[%c0_4, %c0_5] : memref<33x8xbf16, #tpu.memory_space<vmem>>, vector<32x8xbf16>
    %c32 = arith.constant 32 : index
    %c0_6 = arith.constant 0 : index
    %11 = vector.load %arg3[%c32, %c0_6] : memref<33x8xbf16, #tpu.memory_space<vmem>>, vector<1x8xbf16>
    %12 = arith.extf %11 : vector<1x8xbf16> to vector<1x8xf32>
    %13 = arith.truncf %9 : vector<8x32xf32> to vector<8x32xbf16>
    %cst_7 = arith.constant dense<0.000000e+00> : vector<8x8xf32>
    %14 = tpu.matmul %13, %10, %cst_7 {dimension_numbers = #tpu.dot_dimension_numbers<[1], [0], [0], [1], [0, 0, 1, 1], [], []>} : vector<8x32xbf16>, vector<32x8xbf16>, vector<8x8xf32> -> vector<8x8xf32>
    %15 = vector.broadcast %12 : vector<1x8xf32> to vector<8x8xf32>
    %16 = arith.addf %14, %15 : vector<8x8xf32>
    %c0_8 = arith.constant 0 : index
    %c0_9 = arith.constant 0 : index
    %17 = vector.load %arg4[%c0_8, %c0_9] : memref<8x8xf32, #tpu.memory_space<vmem>>, vector<8x8xf32>
    tpu.vector_store %arg4[%c0_8, %c0_9], %16 {strides = array<i32>} : memref<8x8xf32, #tpu.memory_space<vmem>>, vector<8x8xf32>,
    return
  }
  func.func @transform_0(%arg0: i32) -> (i32, i32) {
    %c0_i32 = arith.constant 0 : i32
    %c0_i32_0 = arith.constant 0 : i32
    return %arg0, %c0_i32 : i32, i32
  }
  func.func @transform_1(%arg0: i32) -> (i32, i32) {
    %c0_i32 = arith.constant 0 : i32
    %c0_i32_0 = arith.constant 0 : i32
    %c0_i32_1 = arith.constant 0 : i32
    return %c0_i32, %c0_i32_0 : i32, i32
  }
  func.func @transform_2(%arg0: i32) -> (i32, i32) {
    %c0_i32 = arith.constant 0 : i32
    %c0_i32_0 = arith.constant 0 : i32
    %c0_i32_1 = arith.constant 0 : i32
    return %c0_i32, %c0_i32_0 : i32, i32
  }
  func.func @transform_3(%arg0: i32) -> (i32, i32) {
    %c0_i32 = arith.constant 0 : i32
    %c0_i32_0 = arith.constant 0 : i32
    return %arg0, %c0_i32 : i32, i32
  }
}

</mosaic_0001>

<bundles_post_ra>
// kernel: forward.1
= control target key start
LH: loop header
LB: loop body
LE: loop exit
PB: predicated region body
PF: predicated region fallthrough
CT: control target
= control target key end

     0   :  { %8 = vsyncpa [#allocation3], 0  ;;  %s267_s0 = inlined_call_operand.vmem [shape: f32[8,1], index: 0, kind: input, shape index: {}]   ;;  %s268_s1 = inlined_call_operand.vmem [shape: f32[2,32], index: 1, kind: input, shape index: {}]   ;;  %s269_s2 = inlined_call_operand.hbm [shape: bf16[33,8], index: 2, kind: input, shape index: {}]   ;;  %s270_s3 = inlined_call_operand.hbm [shape: f32[8,8], index: 3, kind: output, shape index: {}]  }
   0x1   :  { %9 = vsyncpa [#allocation4], 0  ;;  %s207_s12 = smov [#allocation2]   ;;  %s159_s16 = scalar_lea.hbm %s269_s2, 320 }
   0x2   :  { %s19_s13 = sshll.u32 %s207_s12, 4  ;;  %p160_p0 = scmp.ne.s32.totalorder %s269_s2, %s159_s16  ;;  %s20_s13 = int_to_ptr.vmem [resolvable:$true] %s19_s13 }
   0x3   :  { %p163_p1 = scmp.lt.u32.totalorder %s159_s16, %s269_s2 }
   0x5   :  { %p165_p2 = pnand %p163_p1, %p160_p0 }
   0x7   :  { %168 = shalt.err (!%p165_p2)
}
   0x8   :  { %s169_s21 = scalar_lea.vmem %s20_s13, 320  ;;  %p174_p4 = scmp.lt.s32.totalorder %s20_s13, %s20_s13 }
   0x9   :  { %p170_p3 = scmp.ne.s32.totalorder %s20_s13, %s169_s21  ;;  %p175_p5 = scmp.lt.s32.totalorder %s169_s21, %s169_s21 }
   0xb   :  { %p176_p6 = por %p175_p5, %p174_p4 }
   0xd   :  { %p177_p7 = pnand %p176_p6, %p170_p3 }
   0xf   :  { %180 = shalt.err (!%p177_p7)
}
  0x10   :  { %s208_s22 = smov 64   ;;  %s209_s23 = smov 4  }
  0x11   :  { %25 = dma.hbm_to_vmem [thread:$0]  %s269_s2, 320, %s20_s13, [#allocation3], %s208_s22, %s208_s22, %s209_s23  }
  0x12   :  { %203 = dma.done.wait [#allocation3], 320  }
  0x13   :  { %204 = vsyncadd [#allocation3], 4294966976  ;;  %v210_v0 = vmov 0   ;;  %v30_v1 = vld [vmem:[%s267_s0] sm:$0xff]  ;;  %v211_v2 = vmov 0.0   ;;  %v157_v3 = vld [vmem:[#allocation2] sm:$0xff]   ;;  %v56_v12 = vlaneseq }
  0x14   :  { %156 = vset.pattern.permute.xlu0 %v210_v0  ;;  %141 = vmatprep.subr.bf16.mxu0 %v211_v2  ;;  %v158_v4 = vld [vmem:[#allocation2 + $0x8] sm:$0xff]   ;;  %vm212_vm0 = vmmov 0   ;;  %v133_v5 = vld [vmem:[%s268_s1] ss:$0 sm:$0xff]  ;;  %v134_v6 = vld [vmem:[%s268_s1 + $0x1] ss:$0 sm:$0xff] }
  0x15   :  { %35 = vperm.xlu0 %156, %v30_v1   ;;  %142 = vmatpush3.bf16.msra.mxu0 %v157_v3  ;;  %vm72_vm1 = vcmask 261120   ;;  %v57_v13 = vshrl.u32 %v56_v12, 7  ;;  %v53_v14 = vld [vmem:[#allocation2 + $0x10] sm:$0x1]  ;;  %s213_s0 = smov [#allocation5]   ;;  %vm116_vm2 = vcmask 64512  }
  0x16   :  { %143 = vmatprep.subr.bf16.mxu0 %v211_v2  ;;  %145 = vmatprep.mubr.msk.bf16.mxu0 %vm212_vm0, %v211_v2  ;;  %v54_v15 = vunpack.c.l.bf16 %v53_v14  ;;  %s124_s4 = sshll.u32 %s213_s0, 4  ;;  %s125_s4 = int_to_ptr.vmem [resolvable:$true] %s124_s4 }
  0x17   :  { %v58_v16 = vsub.s32 0, %v57_v13  ;;  %s181_s1 = scalar_lea.vmem %s125_s4, 128  ;;  %p186_p9 = scmp.lt.s32.totalorder %s125_s4, %s125_s4 }
  0x18   :  { %p182_p8 = scmp.ne.s32.totalorder %s125_s4, %s181_s1  ;;  %p187_p10 = scmp.lt.s32.totalorder %s181_s1, %s181_s1 }
  0x19   :  { %144 = vmatpush3.bf16.msra.mxu0 %v158_v4  ;;  %v59_v17 = vrot.slane %v54_v15, %v58_v16 }
  0x1a   :  { %p188_p11 = por %p187_p10, %p186_p9 }
  0x1c   :  { %p189_p12 = pnand %p188_p11, %p182_p8 }
  0x94   :  { %v36_v7 = vpop.permute.xlu0 %35 }
  0x95   :  { %v42_v8 = vmul.f32 %v133_v5, %v36_v7 }
  0x97   :  { %v47_v9 = vadd.f32 %v134_v6, %v42_v8 }
  0x99   :  { %v48_v10 = vmax.f32 %v47_v9, 0.0 }
  0x9b   :  { %v55_v11 = vpack.c.bf16 %v48_v10, %v48_v10 }
  0x9d   :  { %146 = vmatmul.mubr.msk.bf16.vlgmr.msra.gmra.mrb[0].mxu0 %vm72_vm1, %v55_v11 }
 0x170   :  { %v110_v18 = vpop.f32.mrb[0].mxu0 }
 0x171   :  { %v111_v19 = vadd.f32 %v110_v18, %v59_v17  ;;  %v147_v20 = vpop.f32.mrb[1].mxu0 }
 0x172   :  { %v113_v21 = vpop.f32.mrb[2].mxu0 }
 0x173   :  { %v148_v22 = vpop.f32.mrb[3].mxu0  ;;  %117 = vst.msk [vmem:[#allocation5] sm:$0xff] %vm116_vm2, %v111_v19 }
 0x174   :  { %192 = shalt.err (!%p189_p12)
}
 0x175   :  { %s193_s7 = scalar_lea.hbm %s270_s3, 128 }
 0x176   :  { %p194_p13 = scmp.ne.s32.totalorder %s270_s3, %s193_s7  ;;  %p197_p0 = scmp.lt.u32.totalorder %s193_s7, %s270_s3 }
 0x178   :  { %p199_p1 = pnand %p197_p0, %p194_p13 }
 0x17a   :  { %202 = shalt.err (!%p199_p1)
}
 0x17b   :  { %127 = dma.vmem_to_hbm [thread:$0]  %s125_s4, 128, %s270_s3, [#allocation4]  }
 0x17c   :  { %205 = dma.done.wait [#allocation4], 128  }
 0x17d   :  { %206 = vsyncadd [#allocation4], 4294967168 }
 0x17e   :  { %131 = vsyncpa [#allocation3], 1 }
 0x17f   :  { %132 = vsyncpa [#allocation4], 1 }

</bundles_post_ra>
